<compile_context>
chip_gen: v5e
topology: v5e:2x2
jax: 0.10.0
libtpu: 0.0.40
codegen_flags: <defaults>
</compile_context>

<pallas_src>
import jax
import jax.numpy as jnp
from jax.experimental import pallas as pl
from jax.experimental.pallas import tpu as pltpu

EPS = 1e-5  # nn.BatchNorm2d default eps


def _round_up(x, m):
    return ((x + m - 1) // m) * m


def cnn_block_forward(x_nchw, weight, bias, gamma, beta):
    """Forward of CNNBlock(downsample=True, activation='relu', use_dropout=False).

    x_nchw: [N, C_in, H, W] f32; weight: [C_out, C_in, 4, 4] (PyTorch OIHW).
    `bias` is mathematically cancelled by training-mode BatchNorm mean subtraction.
    """
    del bias  # cancelled exactly by the BN batch-mean subtraction
    N, C_in, H, W = x_nchw.shape
    C_out = weight.shape[0]
    assert H % 2 == 0 and W % 2 == 0, "k=4,s=2,p=1 downsample expects even H, W"
    OH, OW = H // 2, W // 2
    OHp, OWp = OH + 1, OW + 1        # parity-split spatial extents of the padded input
    M = N * OH * OW                  # number of real output pixels (BN divisor)

    C_pad = _round_up(C_out, 128)    # lane-dense output channels
    CK = 4 * C_in                    # contraction depth per (di, dj) offset group

    # Common-grid rows per image: r = oh*OWp + ow'; rows with ow' == OW are garbage
    # by construction and are masked out of the stats / sliced off at the end.
    ROWS = OH * OWp
    ROWS_BLK = _round_up(ROWS, 8)
    # Per-image Q rows must cover the largest slice start (OWp + 1) + ROWS_BLK.
    R_pad = _round_up(max(OHp * OWp, OWp + 1 + ROWS_BLK), 8)

    # ---- wrapper glue (cheap, ~1x input bytes): reflect pad + parity split ----
    x = jnp.transpose(x_nchw, (0, 2, 3, 1))                             # NHWC
    xp = jnp.pad(x, ((0, 0), (1, 1), (1, 1), (0, 0)), mode="reflect")   # [N,H+2,W+2,Cin]
    parts = []
    for pi in range(2):
        for pj in range(2):
            sub = xp[:, pi::2, pj::2, :].reshape(N, OHp * OWp, C_in)
            sub = jnp.pad(sub, ((0, 0), (0, R_pad - OHp * OWp), (0, 0)))
            parts.append(sub)
    q = jnp.concatenate(parts, axis=-1)                                  # [N,R_pad,4*Cin]
    q = q.reshape(N * R_pad, CK).astype(jnp.bfloat16)

    # Weight OIHW -> per-(di,dj) slabs [4*C_in, C_pad]; column blocks ordered (pi,pj,c)
    # to match the parity concatenation above.
    wt = jnp.transpose(weight, (2, 3, 1, 0))                             # [kh,kw,Cin,Cout]
    wg = jnp.zeros((4, CK, C_out), weight.dtype)
    for di in range(2):
        for dj in range(2):
            for pi in range(2):
                for pj in range(2):
                    blk = (pi * 2 + pj) * C_in
                    wg = wg.at[di * 2 + dj, blk:blk + C_in, :].set(
                        wt[2 * di + pi, 2 * dj + pj])
    wg = jnp.pad(wg, ((0, 0), (0, 0), (0, C_pad - C_out))).astype(jnp.bfloat16)

    # Static valid-row mask on the common grid (tiny input; avoids in-kernel int mod).
    r = jnp.arange(ROWS_BLK)
    mask = ((r < ROWS) & ((r % OWp) < OW)).astype(jnp.float32).reshape(ROWS_BLK, 1)

    cparams = pltpu.CompilerParams(
        dimension_semantics=("parallel",),        # image blocks are independent
        vmem_limit_bytes=48 * 1024 * 1024,        # > v5e/v6e scoped defaults, < v7x 64 MiB
    )

    # ---- pass 1: in-kernel im2col conv (4 contiguous-slice matmuls) + BN partials ----
    def conv_stats_kernel(q_ref, w_ref, mask_ref, conv_ref, stats_ref):
        acc = jnp.zeros((ROWS_BLK, C_pad), jnp.float32)
        for di in range(2):
            for dj in range(2):
                start = di * OWp + dj                                   # static offsets
                lhs = q_ref[start:start + ROWS_BLK, :]                  # [ROWS_BLK, 4*Cin]
                acc = acc + jnp.dot(lhs, w_ref[di * 2 + dj],
                                    preferred_element_type=jnp.float32)
        conv_ref[...] = acc.astype(conv_ref.dtype)                      # bf16 intermediate
        m = mask_ref[...]                                               # (ROWS_BLK, 1)
        s1 = jnp.sum(acc * m, axis=0, keepdims=True)                    # (1, C_pad)
        s2 = jnp.sum(acc * acc * m, axis=0, keepdims=True)              # (1, C_pad)
        rows = jax.lax.broadcasted_iota(jnp.int32, stats_ref.shape, 0)
        # row 0 = sum, row 1 = sum of squares, rows 2..7 = 0 -> single unmasked store.
        stats_ref[...] = jnp.where(rows == 0, s1, 0.0) + jnp.where(rows == 1, s2, 0.0)

    conv, stats = pl.pallas_call(
        conv_stats_kernel,
        out_shape=(
            jax.ShapeDtypeStruct((N * ROWS_BLK, C_pad), jnp.bfloat16),
            jax.ShapeDtypeStruct((8 * N, C_pad), jnp.float32),
        ),
        grid=(N,),
        in_specs=[
            pl.BlockSpec((R_pad, CK), lambda n: (n, 0)),
            pl.BlockSpec((4, CK, C_pad), lambda n: (0, 0, 0)),
            pl.BlockSpec((ROWS_BLK, 1), lambda n: (0, 0)),
        ],
        out_specs=(
            pl.BlockSpec((ROWS_BLK, C_pad), lambda n: (n, 0)),
            pl.BlockSpec((8, C_pad), lambda n: (n, 0)),
        ),
        compiler_params=cparams,
    )(q, wg, mask)

    # ---- combine stats and fold BN into one per-channel scale/shift (tiny vectors) ----
    st = stats.reshape(N, 8, C_pad).sum(axis=0)
    mean = st[0] / M                                   # biased (training-mode) batch stats
    var = jnp.maximum(st[1] / M - mean * mean, 0.0)    # f32; guard cancellation
    scale = jnp.pad(gamma.astype(jnp.float32), (0, C_pad - C_out)) * jax.lax.rsqrt(var + EPS)
    shift = jnp.pad(beta.astype(jnp.float32), (0, C_pad - C_out)) - mean * scale
    params = jnp.zeros((8, C_pad), jnp.float32).at[0].set(scale).at[1].set(shift)

    # ---- pass 2: fused normalize + affine + ReLU, large streaming tile ----
    total_rows = N * ROWS_BLK
    d = 1
    for cand in range(N, 0, -1):
        if N % cand == 0 and ROWS_BLK * cand <= 4096:
            d = cand
            break
    tile2 = ROWS_BLK * d

    def bn_relu_kernel(conv_ref, par_ref, o_ref):
        par = par_ref[...]                  # (8, C_pad); row 0 = scale, row 1 = shift
        scl = par[0:1, :]
        sft = par[1:2, :]
        o_ref[...] = jnp.maximum(conv_ref[...].astype(jnp.float32) * scl + sft, 0.0)

    y = pl.pallas_call(
        bn_relu_kernel,
        out_shape=jax.ShapeDtypeStruct((total_rows, C_pad), jnp.float32),
        grid=(total_rows // tile2,),
        in_specs=[
            pl.BlockSpec((tile2, C_pad), lambda i: (i, 0)),
            pl.BlockSpec((8, C_pad), lambda i: (0, 0)),
        ],
        out_specs=pl.BlockSpec((tile2, C_pad), lambda i: (i, 0)),
        compiler_params=cparams,
    )(conv, params)

    # Drop the common-grid filler column / padding and the channel padding.
    y = y.reshape(N, ROWS_BLK, C_pad)[:, :ROWS, :]
    y = y.reshape(N, OH, OWp, C_pad)[:, :, :OW, :C_out]
    return jnp.transpose(y, (0, 3, 1, 2))              # back to NCHW
    # TODO(synk): LeakyReLU(0.2), Dropout(0.5) and ConvTranspose2d (downsample=False)
    # branches of the module are not exercised by the default config and are omitted.


def ref_forward(x, weight, bias, gamma, beta):
    """Pure-JAX reference of the PyTorch forward (training-mode BN) at the kernel's
    precision policy: bf16 conv operands, f32 accumulation, bf16-stored conv
    intermediate, f32 stats / BN / ReLU.  The conv bias is dropped because the
    training-mode batch-mean subtraction cancels it exactly."""
    del bias
    xp = jnp.pad(x.astype(jnp.bfloat16), ((0, 0), (0, 0), (1, 1), (1, 1)), mode="reflect")
    conv = jax.lax.conv_general_dilated(
        xp, weight.astype(jnp.bfloat16), window_strides=(2, 2), padding="VALID",
        dimension_numbers=("NCHW", "OIHW", "NCHW"),
        preferred_element_type=jnp.float32)
    mean = jnp.mean(conv, axis=(0, 2, 3), keepdims=True)
    var = jnp.var(conv, axis=(0, 2, 3), keepdims=True)
    conv_b = conv.astype(jnp.bfloat16).astype(jnp.float32)   # mirror the bf16 intermediate
    y = (conv_b - mean) * jax.lax.rsqrt(var + EPS)
    y = y * gamma[None, :, None, None] + beta[None, :, None, None]
    return jnp.maximum(y, 0.0)


if __name__ == "__main__":
    key = jax.random.PRNGKey(0)
    k_x, k_w, k_b, k_g, k_beta = jax.random.split(key, 5)

    N, C_in, H, W = 2, 4, 16, 16
    C_out = 8

    x = jax.random.normal(k_x, (N, C_in, H, W), dtype=jnp.float32)
    weight = 0.1 * jax.random.normal(k_w, (C_out, C_in, 4, 4), dtype=jnp.float32)
    bias = 0.1 * jax.random.normal(k_b, (C_out,), dtype=jnp.float32)
    gamma = 1.0 + 0.1 * jax.random.normal(k_g, (C_out,), dtype=jnp.float32)
    beta = 0.1 * jax.random.normal(k_beta, (C_out,), dtype=jnp.float32)

    out = jax.block_until_ready(cnn_block_forward(x, weight, bias, gamma, beta))
    ref = jax.block_until_ready(ref_forward(x, weight, bias, gamma, beta))

    assert out.shape == (N, C_out, H // 2, W // 2), out.shape
    max_err = float(jnp.max(jnp.abs(out - ref)))
    # bf16-stored conv intermediate -> allow ~1 bf16 ulp of the pre-BN activations.
    assert jnp.allclose(out, ref, atol=5e-3, rtol=5e-3), f"max_err={max_err}"

    print("KERNEL_OK")
</pallas_src>

<mosaic_0001>
module attributes {stable_mosaic.version = 11 : i64} {
  func.func @conv_stats_kernel(%arg0: i32, %arg1: memref<88x16xbf16, #tpu.memory_space<vmem>>, %arg2: memref<4x16x128xbf16, #tpu.memory_space<vmem>>, %arg3: memref<72x1xf32, #tpu.memory_space<vmem>>, %arg4: memref<72x128xbf16, #tpu.memory_space<vmem>>, %arg5: memref<8x128xf32, #tpu.memory_space<vmem>>) attributes {dimension_semantics = [#tpu.dimension_semantics<parallel>], iteration_bounds = array<i64: 2>, scalar_prefetch = 0 : i64, scratch_operands = 0 : i64, tpu.core_type = #tpu.core_type<tc>, window_params = [{transform_indices = @transform_0, window_bounds = array<i64: 88, 16>}, {pipeline_mode = #tpu.pipeline_mode<synchronous>, transform_indices = @transform_1, window_bounds = array<i64: 4, 16, 128>}, {pipeline_mode = #tpu.pipeline_mode<synchronous>, transform_indices = @transform_2, window_bounds = array<i64: 72, 1>}, {transform_indices = @transform_3, window_bounds = array<i64: 72, 128>}, {transform_indices = @transform_4, window_bounds = array<i64: 8, 128>}]} {
    %cst = arith.constant 0.000000e+00 : f32
    %0 = vector.broadcast %cst : f32 to vector<72x128xf32>
    %c0 = arith.constant 0 : index
    %c0_0 = arith.constant 0 : index
    %1 = vector.load %arg1[%c0, %c0_0] : memref<88x16xbf16, #tpu.memory_space<vmem>>, vector<72x16xbf16>
    %c0_1 = arith.constant 0 : index
    %c0_2 = arith.constant 0 : index
    %c0_3 = arith.constant 0 : index
    %2 = vector.load %arg2[%c0_1, %c0_2, %c0_3] : memref<4x16x128xbf16, #tpu.memory_space<vmem>>, vector<1x16x128xbf16>
    %3 = vector.shape_cast %2 : vector<1x16x128xbf16> to vector<16x128xbf16>
    %cst_4 = arith.constant dense<0.000000e+00> : vector<72x128xf32>
    %4 = tpu.matmul %1, %3, %cst_4 {dimension_numbers = #tpu.dot_dimension_numbers<[1], [0], [0], [1], [0, 0, 1, 1], [], []>} : vector<72x16xbf16>, vector<16x128xbf16>, vector<72x128xf32> -> vector<72x128xf32>
    %5 = arith.addf %0, %4 : vector<72x128xf32>
    %c1 = arith.constant 1 : index
    %c0_5 = arith.constant 0 : index
    %6 = vector.load %arg1[%c1, %c0_5] : memref<88x16xbf16, #tpu.memory_space<vmem>>, vector<72x16xbf16>
    %c1_6 = arith.constant 1 : index
    %c0_7 = arith.constant 0 : index
    %c0_8 = arith.constant 0 : index
    %7 = vector.load %arg2[%c1_6, %c0_7, %c0_8] : memref<4x16x128xbf16, #tpu.memory_space<vmem>>, vector<1x16x128xbf16>
    %8 = vector.shape_cast %7 : vector<1x16x128xbf16> to vector<16x128xbf16>
    %cst_9 = arith.constant dense<0.000000e+00> : vector<72x128xf32>
    %9 = tpu.matmul %6, %8, %cst_9 {dimension_numbers = #tpu.dot_dimension_numbers<[1], [0], [0], [1], [0, 0, 1, 1], [], []>} : vector<72x16xbf16>, vector<16x128xbf16>, vector<72x128xf32> -> vector<72x128xf32>
    %10 = arith.addf %5, %9 : vector<72x128xf32>
    %c9 = arith.constant 9 : index
    %c0_10 = arith.constant 0 : index
    %11 = vector.load %arg1[%c9, %c0_10] : memref<88x16xbf16, #tpu.memory_space<vmem>>, vector<72x16xbf16>
    %c2 = arith.constant 2 : index
    %c0_11 = arith.constant 0 : index
    %c0_12 = arith.constant 0 : index
    %12 = vector.load %arg2[%c2, %c0_11, %c0_12] : memref<4x16x128xbf16, #tpu.memory_space<vmem>>, vector<1x16x128xbf16>
    %13 = vector.shape_cast %12 : vector<1x16x128xbf16> to vector<16x128xbf16>
    %cst_13 = arith.constant dense<0.000000e+00> : vector<72x128xf32>
    %14 = tpu.matmul %11, %13, %cst_13 {dimension_numbers = #tpu.dot_dimension_numbers<[1], [0], [0], [1], [0, 0, 1, 1], [], []>} : vector<72x16xbf16>, vector<16x128xbf16>, vector<72x128xf32> -> vector<72x128xf32>
    %15 = arith.addf %10, %14 : vector<72x128xf32>
    %c10 = arith.constant 10 : index
    %c0_14 = arith.constant 0 : index
    %16 = vector.load %arg1[%c10, %c0_14] : memref<88x16xbf16, #tpu.memory_space<vmem>>, vector<72x16xbf16>
    %c3 = arith.constant 3 : index
    %c0_15 = arith.constant 0 : index
    %c0_16 = arith.constant 0 : index
    %17 = vector.load %arg2[%c3, %c0_15, %c0_16] : memref<4x16x128xbf16, #tpu.memory_space<vmem>>, vector<1x16x128xbf16>
    %18 = vector.shape_cast %17 : vector<1x16x128xbf16> to vector<16x128xbf16>
    %cst_17 = arith.constant dense<0.000000e+00> : vector<72x128xf32>
    %19 = tpu.matmul %16, %18, %cst_17 {dimension_numbers = #tpu.dot_dimension_numbers<[1], [0], [0], [1], [0, 0, 1, 1], [], []>} : vector<72x16xbf16>, vector<16x128xbf16>, vector<72x128xf32> -> vector<72x128xf32>
    %20 = arith.addf %15, %19 : vector<72x128xf32>
    %21 = arith.truncf %20 : vector<72x128xf32> to vector<72x128xbf16>
    %c0_18 = arith.constant 0 : index
    %c0_19 = arith.constant 0 : index
    %22 = vector.load %arg4[%c0_18, %c0_19] : memref<72x128xbf16, #tpu.memory_space<vmem>>, vector<72x128xbf16>
    tpu.vector_store %arg4[%c0_18, %c0_19], %21 {strides = array<i32>} : memref<72x128xbf16, #tpu.memory_space<vmem>>, vector<72x128xbf16>,
    %c0_20 = arith.constant 0 : index
    %c0_21 = arith.constant 0 : index
    %23 = vector.load %arg3[%c0_20, %c0_21] : memref<72x1xf32, #tpu.memory_space<vmem>>, vector<72x1xf32>
    %24 = vector.broadcast %23 : vector<72x1xf32> to vector<72x128xf32>
    %25 = arith.mulf %20, %24 : vector<72x128xf32>
    %cst_22 = arith.constant dense<0.000000e+00> : vector<128xf32>
    %26 = vector.multi_reduction <add>, %25, %cst_22 [0] : vector<72x128xf32> to vector<128xf32>
    %27 = vector.shape_cast %26 : vector<128xf32> to vector<1x128xf32>
    %28 = arith.mulf %20, %20 : vector<72x128xf32>
    %29 = vector.broadcast %23 : vector<72x1xf32> to vector<72x128xf32>
    %30 = arith.mulf %28, %29 : vector<72x128xf32>
    %cst_23 = arith.constant dense<0.000000e+00> : vector<128xf32>
    %31 = vector.multi_reduction <add>, %30, %cst_23 [0] : vector<72x128xf32> to vector<128xf32>
    %32 = vector.shape_cast %31 : vector<128xf32> to vector<1x128xf32>
    %33 = tpu.iota {dimensions = array<i32: 0>} : vector<8x128xi32>
    %c0_i32 = arith.constant 0 : i32
    %34 = vector.broadcast %c0_i32 : i32 to vector<8x128xi32>
    %35 = arith.cmpi eq, %33, %34 : vector<8x128xi32>
    %cst_24 = arith.constant 0.000000e+00 : f32
    %36 = vector.shape_cast %27 : vector<1x128xf32> to vector<1x128xf32>
    %37 = vector.broadcast %36 : vector<1x128xf32> to vector<8x128xf32>
    %38 = vector.broadcast %cst_24 : f32 to vector<8x128xf32>
    %39 = arith.select %35, %37, %38 : vector<8x128xi1>, vector<8x128xf32>
    %c1_i32 = arith.constant 1 : i32
    %40 = vector.broadcast %c1_i32 : i32 to vector<8x128xi32>
    %41 = arith.cmpi eq, %33, %40 : vector<8x128xi32>
    %cst_25 = arith.constant 0.000000e+00 : f32
    %42 = vector.shape_cast %32 : vector<1x128xf32> to vector<1x128xf32>
    %43 = vector.broadcast %42 : vector<1x128xf32> to vector<8x128xf32>
    %44 = vector.broadcast %cst_25 : f32 to vector<8x128xf32>
    %45 = arith.select %41, %43, %44 : vector<8x128xi1>, vector<8x128xf32>
    %46 = arith.addf %39, %45 : vector<8x128xf32>
    %c0_26 = arith.constant 0 : index
    %c0_27 = arith.constant 0 : index
    %47 = vector.load %arg5[%c0_26, %c0_27] : memref<8x128xf32, #tpu.memory_space<vmem>>, vector<8x128xf32>
    tpu.vector_store %arg5[%c0_26, %c0_27], %46 {strides = array<i32>} : memref<8x128xf32, #tpu.memory_space<vmem>>, vector<8x128xf32>,
    return
  }
  func.func @transform_0(%arg0: i32) -> (i32, i32) {
    %c0_i32 = arith.constant 0 : i32
    %c0_i32_0 = arith.constant 0 : i32
    return %arg0, %c0_i32 : i32, i32
  }
  func.func @transform_1(%arg0: i32) -> (i32, i32, i32) {
    %c0_i32 = arith.constant 0 : i32
    %c0_i32_0 = arith.constant 0 : i32
    %c0_i32_1 = arith.constant 0 : i32
    %c0_i32_2 = arith.constant 0 : i32
    return %c0_i32, %c0_i32_0, %c0_i32_1 : i32, i32, i32
  }
  func.func @transform_2(%arg0: i32) -> (i32, i32) {
    %c0_i32 = arith.constant 0 : i32
    %c0_i32_0 = arith.constant 0 : i32
    %c0_i32_1 = arith.constant 0 : i32
    return %c0_i32, %c0_i32_0 : i32, i32
  }
  func.func @transform_3(%arg0: i32) -> (i32, i32) {
    %c0_i32 = arith.constant 0 : i32
    %c0_i32_0 = arith.constant 0 : i32
    return %arg0, %c0_i32 : i32, i32
  }
  func.func @transform_4(%arg0: i32) -> (i32, i32) {
    %c0_i32 = arith.constant 0 : i32
    %c0_i32_0 = arith.constant 0 : i32
    return %arg0, %c0_i32 : i32, i32
  }
}

</mosaic_0001>

<bundles_post_ra>
// kernel: tpu_custom_call.1
= control target key start
LH: loop header
LB: loop body
LE: loop exit
PB: predicated region body
PF: predicated region fallthrough
CT: control target
= control target key end

     0   :  { %10 = vsyncpa [#allocation3], 0  ;;  %s1383_s0 = inlined_call_operand.vmem [shape: bf16[176,16], index: 0, kind: input, shape index: {}]   ;;  %s1384_s1 = inlined_call_operand.vmem [shape: bf16[4,16,128], index: 1, kind: input, shape index: {}]   ;;  %s1385_s2 = inlined_call_operand.vmem [shape: f32[72,1], index: 2, kind: input, shape index: {}]   ;;  %s1386_s3 = inlined_call_operand.hbm [shape: bf16[144,128], index: 3, kind: output, shape index: {0}]   ;;  %s1387_s4 = inlined_call_operand.hbm [shape: f32[16,128], index: 4, kind: output, shape index: {1}]  }
   0x1   :  { %12 = vsyncpa [#allocation3 + $0x1], 0 }
   0x2   :  { %13 = vsyncpa [#allocation5], 0 }
   0x3   :  { %15 = vsyncpa [#allocation5 + $0x1], 0  ;;  %s1181_s15 = smov 0   ;;  %s1183_s16 = smov 0  }
   0x4   :  { %s1185_s17 = smov 0   ;;  %s1187_s18 = smov 0  }
   0x5 LB: > { %s1202_s19 = sadd.s32 4294967295, %s1151_s18   ;;  %s882_s20 = sadd.s32 4294967294, %s1151_s18   ;;  %s1151_s18 = sphi %s1187_s18, %s1393_s18   ;;  %s1147_s17 = sphi %s1185_s17, %s1392_s17   ;;  %s1143_s16 = sphi %s1183_s16, %s1391_s16   ;;  %s1139_s15 = sphi %s1181_s15, %s1390_s15  }
   0x6   : > { %s1206_s21 = sadd.s32 1, %s1151_s18   ;;  %s96_s22 = sadd.s32 1, %s1147_s17 }
   0x7   : > { %s93_s23 = ssub.s32 %s1151_s18, %s1206_s21  ;;  %p106_p0 = scmp.ne.s32.totalorder %s1147_s17, %s1143_s16 }
   0x8   : > { %p94_p1 = scmp.eq.s32.totalorder %s93_s23, 0  ;;  %p107_p2 = scmp.eq.s32.totalorder %s1202_s19, 1 }
   0x9   : > { %p112_p3 = scmp.ne.s32.totalorder %s1143_s16, %s1139_s15  ;;  %p113_p4 = scmp.eq.s32.totalorder %s882_s20, 1 }
   0xa   : > { %s1217_s24 = scalar_select %p94_p1, %s1147_s17, %s96_s22  }
   0xb   : > { %p1219_p5 = por %p107_p2, %p106_p0  ;;  %p1223_p6 = por %p113_p4, %p112_p3 }
   0xc   : > { %p885_p7 = scmp.ge.s32.totalorder %s1151_s18, 1  ;;  %p172_p8 = scmp.lt.s32.totalorder %s1151_s18, 3 }
   0xe   : > { %p173_p9 = pnand %p885_p7, %p172_p8 }
   0xf   : > { %s203_s7 = smul.u32 (!%p173_p9), 11, %s1202_s19 }
  0x10   : > { %176 = sbr.rel (%p173_p9) target bundleno = 258 (0x102), region = 32 }
  0x11   : > { %p204_p10 = scmp.lt.s32.totalorder (!%p173_p9), %s203_s7, 21  ;;  %s979_s27 = smul.u32 (!%p173_p9), 36, %s1202_s19 }
  0x13   : > { %s769_s30 = scalar_lea.hbm (!%p173_p9), %s1386_s3, %s979_s27 }
  0x14   : > { %s772_s6 = sshll.u32 (!%p173_p9), %s769_s30, 4  ;;  %s773_s6 = int_to_ptr.hbm [resolvable:$true] %s772_s6 }
  0x15   : > { %v971_v0 = vld [vmem:[%s1384_s1] sm:$0xff]  ;;  %v978_v1 = vld [vmem:[%s1384_s1 + $0x18] sm:$0xff]  ;;  %v972_v2 = vld [vmem:[%s1384_s1 + $0x8] sm:$0xff]  ;;  %s1395_s7 = smov (!%p204_p10, %s203_s7), 21  ;;  %v1153_v5 = vmov 0   ;;  %vm297_vm0 = vcmask 130048  }
  0x16   : > { %v977_v3 = vld [vmem:[%s1384_s1 + $0x10] sm:$0xff]  ;;  %371 = vmatpush.bf16.msra.mxu1 %v971_v0  ;;  %582 = vmatpush.bf16.msra.mxu3 %v978_v1  ;;  %v635_v4 = vld [vmem:[%s1385_s2] sm:$0xff]  ;;  %s887_s12 = sshll.u32 %s1395_s7, 2  ;;  %vm544_vm1 = vcmask 1046528   ;;  %vm251_vm2 = vsmask.f32 7424 }
  0x17   : > { %320 = vmatpush.bf16.msra.mxu0 %v972_v2  ;;  %502 = vmatpush.bf16.msra.mxu2 %v977_v3  ;;  %s1248_s20 = scalar_lea.vmem %s1383_s0, %s887_s12  ;;  %v636_v29 = vld [vmem:[%s1385_s2 + $0x8] sm:$0xff]  ;;  %v637_v32 = vld [vmem:[%s1385_s2 + $0x10] sm:$0xff]  ;;  %v638_v46 = vld [vmem:[%s1385_s2 + $0x18] sm:$0xff]  ;;  %s1071_s8 = sshra.s32 %s773_s6, 4  ;;  %s1072_s8 = int_to_ptr.hbm [resolvable:$true] %s1071_s8 }
  0x18   : > { %1051 = vset.pattern.permute.xlu0 %v1153_v5  ;;  %1052 = vset.pattern.permute.xlu1 %v1153_v5  ;;  %v967_v6 = vld [vmem:[%s1248_s20] sm:$0xff]  ;;  %v1054_v8 = vld [vmem:[%s1248_s20 + $0x4] sm:$0xf0]  ;;  %v973_v9 = vld [vmem:[%s1248_s20 + $0xc] sm:$0xff]  ;;  %s1073_s9 = scalar_lea.hbm %s1072_s8, 36  ;;  %s1077_s12 = scalar_lea.hbm %s1386_s3, 72 }
  0x19   : > { %646 = vperm.xlu0 %1051, %v635_v4   ;;  %1053 = vset.pattern.permute.xlu2 %v1153_v5  ;;  %v398_v7 = vld [vmem:[%s1248_s20 + $0x4] sm:$0xff]   ;;  %v255_v12 = vshll.u32 %v967_v6, 16  ;;  %v253_v13 = vshrl.u32 %v967_v6, 16  ;;  %v443_v15 = vshll.u32 %v973_v9, 16  ;;  %v546_v17 = vrot.slane %v973_v9, 1  ;;  %v969_v30 = vld [vmem:[%s1248_s20 + $0x10] sm:$0xff]  ;;  %p1074_p11 = scmp.ne.s32.totalorder %s1072_s8, %s1073_s9  ;;  %p1078_p0 = scmp.lt.s32.totalorder %s1072_s8, %s1386_s3 }
  0x1a   : > { %v1055_v10 = vld [vmem:[%s1248_s20 + $0x4] sm:$0xe]  ;;  %v968_v11 = vld [vmem:[%s1248_s20 + $0x8] sm:$0xff]  ;;  %919 = vmatmul.msk.bf16.vlgmr.msra.gmra.mxu1 %vm297_vm0, %v967_v6  ;;  %v436_v20 = vshrl.u32 %v398_v7, 16  ;;  %v438_v21 = vshll.u32 %v398_v7, 16  ;;  %656 = vperm.xlu1 %1052, %v637_v32   ;;  %v974_v33 = vld [vmem:[%s1248_s20 + $0x14] sm:$0xff]  ;;  %p1079_p1 = scmp.lt.s32.totalorder %s1077_s12, %s1073_s9 }
  0x1b   : > { %v260_v14 = vshll.u32 %v968_v11, 16  ;;  %v1056_v16 = vor.u32 %v1055_v10, %v1054_v8  ;;  %v257_v18 = vrot.slane %v255_v12, 1  ;;  %v445_v25 = vrot.slane %v443_v15, 1  ;;  %v970_v47 = vld [vmem:[%s1248_s20 + $0x18] sm:$0xff]  ;;  %v219_v56 = vld [vmem:[%s1248_s20 + $0x20] sm:$0xf]  ;;  %p1075_p12 = pnand %p1074_p11, %p1219_p5 }
  0x1c   : > { %v440_v24 = vrot.slane %v438_v21, 1  ;;  %v264_v34 = vshrl.u32 %v968_v11, 16  ;;  %v268_v35 = vshll.u32 %v969_v30, 16  ;;  %v447_v36 = vshrl.u32 %v973_v9, 16  ;;  %v975_v48 = vld [vmem:[%s1248_s20 + $0x1c] sm:$0xff]  ;;  %v641_v4 = vld [vmem:[%s1385_s2 + $0x30] sm:$0xff]  ;;  %p1080_p2 = por %p1079_p1, %p1078_p0 }
  0x1d   : > { %v262_v19 = vrot.slane %v260_v14, 1  ;;  %v545_v22 = vrot.slane %v1056_v16, 1  ;;  %v258_v23 = vor.u32 %v257_v18, %v253_v13  ;;  %v451_v37 = vshll.u32 %v974_v33, 16  ;;  %v222_v57 = vld [vmem:[%s1248_s20 + $0x24] sm:$0x1]  ;;  %v642_v5 = vld [vmem:[%s1385_s2 + $0x38] sm:$0xff]  ;;  %p1076_p13 = pneg %p1075_p12 }
  0x1e   : > { %v441_v28 = vor.u32 %v440_v24, %v436_v20  ;;  %v548_v38 = vrot.slane %v974_v33, 1  ;;  %v270_v40 = vrot.slane %v268_v35, 1  ;;  %v449_v41 = vor.u32 %v447_v36, %v445_v25  ;;  %v940_v2 = vld [vmem:[%s1248_s20 + $0x24] sm:$0xf]  ;;  %v976_v3 = vld [vmem:[%s1248_s20 + $0x24] sm:$0x10] }
  0x1f   : > { %v547_v26 = vsel %vm544_vm1, %v545_v22, %v546_v17  ;;  %v263_v27 = vsel %vm251_vm2, %v258_v23, %v262_v19  ;;  %v266_v39 = vor.u32 %v264_v34, %v262_v19  ;;  %v453_v42 = vrot.slane %v451_v37, 1  ;;  %v639_v6 = vld [vmem:[%s1385_s2 + $0x20] sm:$0xff]  ;;  %v640_v15 = vld [vmem:[%s1385_s2 + $0x28] sm:$0xff]  ;;  %s1321_s20 = sand.u32 1, %s1143_s16   ;;  %p1081_p3 = pnand %p1080_p2, %p1076_p13 }
  0x20   : > { %957 = vmatmul.msk.bf16.vlgmr.msra.gmra.mxu3 %vm297_vm0, %v547_v26  ;;  %910 = vmatmul.msk.bf16.vlgmr.msra.gmra.mxu0 %vm297_vm0, %v263_v27  ;;  %v446_v31 = vsel %vm251_vm2, %v441_v28, %v445_v25  ;;  %v549_v43 = vsel %vm544_vm1, %v546_v17, %v548_v38  ;;  %v272_v49 = vshrl.u32 %v969_v30, 16  ;;  %v276_v50 = vshll.u32 %v970_v47, 16  ;;  %v643_v21 = vld [vmem:[%s1385_s2 + $0x40] sm:$0xff]  ;;  %s1003_s22 = smul.u32 36, %s1321_s20  ;;  %s753_s7 = scalar_lea.sflag [#allocation3], %s1321_s20 }
  0x21   : > { %651 = vperm.xlu0 %1051, %v636_v29   ;;  %946 = vmatmul.msk.bf16.vlgmr.msra.gmra.mxu2 %vm297_vm0, %v446_v31  ;;  %v271_v44 = vsel %vm251_vm2, %v266_v39, %v270_v40  ;;  %v454_v45 = vsel %vm251_vm2, %v449_v41, %v453_v42  ;;  %v455_v51 = vshrl.u32 %v974_v33, 16  ;;  %v459_v52 = vshll.u32 %v975_v48, 16 }
  0x22   : > { %661 = vperm.xlu1 %1052, %v638_v46   ;;  %v550_v53 = vrot.slane %v975_v48, 1  ;;  %v274_v54 = vor.u32 %v272_v49, %v270_v40  ;;  %v278_v55 = vrot.slane %v276_v50, 1  ;;  %v244_v62 = vunpack.c.l.b16 %v219_v56  ;;  %666 = vperm.xlu2 %1053, %v639_v6   ;;  %s1324_s23 = scalar_lea.vmem [#allocation2], %s1003_s22 }
  0x23   : > { %v457_v58 = vor.u32 %v455_v51, %v453_v42  ;;  %v461_v59 = vrot.slane %v459_v52, 1  ;;  %v245_v63 = vunpack.c.l.b16 %v222_v57  ;;  %v941_v7 = vor.u32 %v976_v3, %v940_v2  ;;  %s770_s5 = sshll.u32 %s1324_s23, 4  ;;  %s1335_s5 = int_to_ptr.vmem [resolvable:$true] %s770_s5 }
  0x24   : > { %v551_v60 = vsel %vm544_vm1, %v548_v38, %v550_v53  ;;  %v279_v61 = vsel %vm251_vm2, %v274_v54, %v278_v55  ;;  %v280_v8 = vshrl.u32 %v970_v47, 16  ;;  %v463_v10 = vshrl.u32 %v975_v48, 16 }
  0x25   : > { %v462_v0 = vsel %vm251_vm2, %v457_v58, %v461_v59  ;;  %v250_v1 = vpack.c.b16 %v245_v63, %v244_v62  ;;  %v552_v12 = vrot.slane %v941_v7, 1  ;;  %v346_v22 = vpack.c.b16 %v244_v62, %v244_v62 }
  0x26   : > { %v282_v13 = vor.u32 %v280_v8, %v278_v55  ;;  %v465_v16 = vor.u32 %v463_v10, %v461_v59  ;;  %v471_v24 = vshrl.u32 %v941_v7, 16 }
  0x27   : > { %v284_v9 = vshll.u32 %v250_v1, 16  ;;  %v553_v18 = vsel %vm544_vm1, %v550_v53, %v552_v12  ;;  %v288_v23 = vshrl.u32 %v250_v1, 16 }
  0x29   : > { %676 = vperm.xlu0 %1051, %v641_v4   ;;  %v286_v14 = vrot.slane %v284_v9, 1 }
  0x2a   : > { %920 = vmatmul.msk.bf16.gmra.mxu1 %vm297_vm0, %v968_v11  ;;  %681 = vperm.xlu1 %1052, %v642_v5   ;;  %v467_v11 = vshll.u32 %v941_v7, 16 }
  0x2b   : > { %v287_v19 = vsel %vm251_vm2, %v282_v13, %v286_v14  ;;  %671 = vperm.xlu2 %1053, %v640_v15   ;;  %v290_v25 = vor.u32 %v288_v23, %v286_v14 }
  0x2c   : > { %v469_v17 = vrot.slane %v467_v11, 1 }
  0x2e   : > { %v470_v20 = vsel %vm251_vm2, %v465_v16, %v469_v17  ;;  %v473_v26 = vor.u32 %v471_v24, %v469_v17 }
  0x30   : > { %958 = vmatmul.msk.bf16.gmra.mxu3 %vm297_vm0, %v549_v43  ;;  %911 = vmatmul.msk.bf16.gmra.mxu0 %vm297_vm0, %v271_v44 }
  0x31   : > { %947 = vmatmul.msk.bf16.gmra.mxu2 %vm297_vm0, %v454_v45 }
  0x33   : > { %686 = vperm.xlu2 %1053, %v643_v21  }
  0x3a   : > { %921 = vmatmul.msk.bf16.gmra.mxu1 %vm297_vm0, %v969_v30 }
  0x40   : > { %959 = vmatmul.msk.bf16.gmra.mxu3 %vm297_vm0, %v551_v60  ;;  %912 = vmatmul.msk.bf16.gmra.mxu0 %vm297_vm0, %v279_v61 }
  0x41   : > { %948 = vmatmul.msk.bf16.gmra.mxu2 %vm297_vm0, %v462_v0 }
  0x4a   : > { %922 = vmatmul.msk.bf16.gmra.mxu1 %vm297_vm0, %v970_v47 }
  0x50   : > { %960 = vmatmul.msk.bf16.gmra.mxu3 %vm297_vm0, %v553_v18  ;;  %913 = vmatmul.msk.bf16.gmra.mxu0 %vm297_vm0, %v287_v19 }
  0x51   : > { %949 = vmatmul.msk.bf16.gmra.mxu2 %vm297_vm0, %v470_v20 }
  0x5a   : > { %923 = vmatmul.msk.bf16.gmra.mxu1 %vm297_vm0, %v346_v22 }
  0x60   : > { %961 = vmatmul.msk.bf16.gmra.mxu3 %vm297_vm0, %v552_v12  ;;  %914 = vmatmul.msk.bf16.gmra.mxu0 %vm297_vm0, %v290_v25 }
  0x61   : > { %950 = vmatmul.msk.bf16.gmra.mxu2 %vm297_vm0, %v473_v26 }
  0x7c   : > { %v667_v14 = vpop.permute.xlu2 %666 }
  0x8b   : > { %v647_v2 = vpop.permute.xlu0 %646 }
  0x8c   : > { %v657_v11 = vpop.permute.xlu1 %656 }
  0x93   : > { %v652_v19 = vpop.permute.xlu0 %651 }
  0x97   : > { %v373_v27 = vpop.f32.mrf.mxu1 }
  0x9d   : > { %v322_v28 = vpop.f32.mrf.mxu0 }
  0x9e   : > { %v374_v34 = vadd.f32 %v373_v27, %v322_v28  ;;  %v662_v27 = vpop.permute.xlu1 %661 }
  0x9f   : > { %v375_v29 = vpop.f32.mrf.mxu1 }
  0xa3   : > { %v584_v30 = vpop.f32.mrf.mxu3 }
  0xa4   : > { %v504_v32 = vpop.f32.mrf.mxu2 }
  0xa5   : > { %v324_v31 = vpop.f32.mrf.mxu0  ;;  %v528_v37 = vadd.f32 %v504_v32, %v374_v34 }
  0xa6   : > { %v376_v36 = vadd.f32 %v375_v29, %v324_v31 }
  0xa7   : > { %v378_v33 = vpop.f32.mrf.mxu1  ;;  %v608_v42 = vadd.f32 %v584_v30, %v528_v37 }
  0xa9   : > { %v712_v21 = vmul.f32 %v608_v42, %v608_v42  ;;  %v689_v29 = vmul.f32 %v647_v2, %v608_v42 }
  0xab   : > { %v586_v35 = vpop.f32.mrf.mxu3 }
  0xac   : > { %v506_v39 = vpop.f32.mrf.mxu2 }
  0xad   : > { %v327_v38 = vpop.f32.mrf.mxu0  ;;  %v529_v41 = vadd.f32 %v506_v39, %v376_v36 }
  0xae   : > { %v379_v49 = vadd.f32 %v378_v33, %v327_v38  ;;  %v721_v33 = vmul.f32 %v712_v21, %v647_v2  ;;  %v682_v2 = vpop.permute.xlu1 %681 }
  0xaf   : > { %v380_v40 = vpop.f32.mrf.mxu1  ;;  %v609_v43 = vadd.f32 %v586_v35, %v529_v41 }
  0xb1   : > { %v983_v44 = vpack.c.bf16 %v609_v43, %v608_v42  ;;  %v713_v20 = vmul.f32 %v609_v43, %v609_v43  ;;  %v690_v24 = vmul.f32 %v652_v19, %v609_v43 }
  0xb3   : > { %v589_v45 = vpop.f32.mrf.mxu3  ;;  %984 = vst [vmem:[%s1324_s23] sm:$0xff] %v983_v44   ;;  %v722_v26 = vmul.f32 %v713_v20, %v652_v19  ;;  %v698_v39 = vadd.f32 %v690_v24, %v689_v29 }
  0xb4   : > { %v509_v47 = vpop.f32.mrf.mxu2 }
  0xb5   : > { %v329_v46 = vpop.f32.mrf.mxu0  ;;  %v530_v52 = vadd.f32 %v509_v47, %v379_v49  ;;  %v730_v44 = vadd.f32 %v722_v26, %v721_v33 }
  0xb6   : > { %v381_v51 = vadd.f32 %v380_v40, %v329_v46 }
  0xb7   : > { %v383_v48 = vpop.f32.mrf.mxu1  ;;  %v610_v57 = vadd.f32 %v589_v45, %v530_v52  ;;  %v672_v45 = vpop.permute.xlu2 %671 }
  0xb9   : > { %v714_v22 = vmul.f32 %v610_v57, %v610_v57  ;;  %v691_v30 = vmul.f32 %v657_v11, %v610_v57 }
  0xbb   : > { %v591_v50 = vpop.f32.mrf.mxu3  ;;  %v723_v34 = vmul.f32 %v714_v22, %v657_v11  ;;  %v699_v47 = vadd.f32 %v698_v39, %v691_v30 }
  0xbc   : > { %v511_v54 = vpop.f32.mrf.mxu2 }
  0xbd   : > { %v332_v53 = vpop.f32.mrf.mxu0  ;;  %v531_v56 = vadd.f32 %v511_v54, %v381_v51  ;;  %v731_v49 = vadd.f32 %v730_v44, %v723_v34 }
  0xbe   : > { %v384_v0 = vadd.f32 %v383_v48, %v332_v53 }
  0xbf   : > { %v385_v55 = vpop.f32.mrf.mxu1  ;;  %v611_v58 = vadd.f32 %v591_v50, %v531_v56 }
  0xc1   : > { %v988_v59 = vpack.c.bf16 %v611_v58, %v610_v57  ;;  %v715_v28 = vmul.f32 %v611_v58, %v611_v58  ;;  %v692_v40 = vmul.f32 %v662_v27, %v611_v58 }
  0xc3   : > { %v594_v60 = vpop.f32.mrf.mxu3  ;;  %1000 = vst [vmem:[%s1324_s23 + $0x8] sm:$0xff] %v988_v59   ;;  %v724_v43 = vmul.f32 %v715_v28, %v662_v27  ;;  %v700_v52 = vadd.f32 %v699_v47, %v692_v40  ;;  %v677_v59 = vpop.permute.xlu0 %676 }
  0xc4   : > { %v514_v62 = vpop.f32.mrf.mxu2 }
  0xc5   : > { %v334_v61 = vpop.f32.mrf.mxu0  ;;  %v532_v4 = vadd.f32 %v514_v62, %v384_v0  ;;  %v732_v57 = vadd.f32 %v731_v49, %v724_v43 }
  0xc6   : > { %v386_v3 = vadd.f32 %v385_v55, %v334_v61 }
  0xc7   : > { %v388_v63 = vpop.f32.mrf.mxu1  ;;  %v612_v9 = vadd.f32 %v594_v60, %v532_v4 }
  0xc9   : > { %v716_v35 = vmul.f32 %v612_v9, %v612_v9  ;;  %v693_v48 = vmul.f32 %v667_v14, %v612_v9 }
  0xcb   : > { %v596_v1 = vpop.f32.mrf.mxu3  ;;  %v725_v50 = vmul.f32 %v716_v35, %v667_v14  ;;  %v701_v60 = vadd.f32 %v700_v52, %v693_v48 }
  0xcc   : > { %v516_v6 = vpop.f32.mrf.mxu2 }
  0xcd   : > { %v337_v5 = vpop.f32.mrf.mxu0  ;;  %v533_v8 = vadd.f32 %v516_v6, %v386_v3  ;;  %v733_v0 = vadd.f32 %v732_v57, %v725_v50 }
  0xce   : > { %v389_v16 = vadd.f32 %v388_v63, %v337_v5 }
  0xcf   : > { %v390_v7 = vpop.f32.mrf.mxu1  ;;  %v613_v10 = vadd.f32 %v596_v1, %v533_v8 }
  0xd1   : > { %v993_v12 = vpack.c.bf16 %v613_v10, %v612_v9  ;;  %v717_v46 = vmul.f32 %v613_v10, %v613_v10  ;;  %v694_v53 = vmul.f32 %v672_v45, %v613_v10 }
  0xd3   : > { %v599_v13 = vpop.f32.mrf.mxu3  ;;  %1001 = vst [vmem:[%s1324_s23 + $0x10] sm:$0xff] %v993_v12   ;;  %v726_v58 = vmul.f32 %v717_v46, %v672_v45  ;;  %v702_v4 = vadd.f32 %v701_v60, %v694_v53  ;;  %v687_v12 = vpop.permute.xlu2 %686 }
  0xd4   : > { %v519_v17 = vpop.f32.mrf.mxu2 }
  0xd5   : > { %v339_v15 = vpop.f32.mrf.mxu0  ;;  %v534_v23 = vadd.f32 %v519_v17, %v389_v16 }
  0xd6   : > { %v391_v31 = vadd.f32 %v390_v7, %v339_v15  ;;  %v734_v7 = vadd.f32 %v733_v0, %v726_v58 }
  0xd7   : > { %v393_v18 = vpop.f32.mrf.mxu1  ;;  %v614_v36 = vadd.f32 %v599_v13, %v534_v23 }
  0xd9   : > { %v718_v51 = vmul.f32 %v614_v36, %v614_v36  ;;  %v695_v61 = vmul.f32 %v677_v59, %v614_v36 }
  0xdb   : > { %v601_v25 = vpop.f32.mrf.mxu3  ;;  %v727_v1 = vmul.f32 %v718_v51, %v677_v59  ;;  %v703_v8 = vadd.f32 %v702_v4, %v695_v61 }
  0xdc   : > { %v521_v37 = vpop.f32.mrf.mxu2 }
  0xdd   : > { %v342_v32 = vpop.f32.mrf.mxu0  ;;  %v535_v41 = vadd.f32 %v521_v37, %v391_v31  ;;  %v735_v11 = vadd.f32 %v734_v7, %v727_v1 }
  0xde   : > { %v394_v54 = vadd.f32 %v393_v18, %v342_v32 }
  0xdf   : > { %v395_v38 = vpop.f32.mrf.mxu1  ;;  %v615_v42 = vadd.f32 %v601_v25, %v535_v41 }
  0xe1   : > { %v998_v55 = vpack.c.bf16 %v615_v42, %v614_v36  ;;  %v719_v62 = vmul.f32 %v615_v42, %v615_v42  ;;  %v696_v5 = vmul.f32 %v682_v2, %v615_v42 }
  0xe3   : > { %v604_v56 = vpop.f32.mrf.mxu3  ;;  %1002 = vst [vmem:[%s1324_s23 + $0x18] sm:$0xff] %v998_v55   ;;  %v728_v9 = vmul.f32 %v719_v62, %v682_v2  ;;  %v704_v13 = vadd.f32 %v703_v8, %v696_v5 }
  0xe4   : > { %v524_v3 = vpop.f32.mrf.mxu2 }
  0xe5   : > { %v344_v63 = vpop.f32.mrf.mxu0  ;;  %v536_v6 = vadd.f32 %v524_v3, %v394_v54  ;;  %v736_v18 = vadd.f32 %v735_v11, %v728_v9 }
  0xe7   : > { %v616_v10 = vadd.f32 %v604_v56, %v536_v6 }
  0xe9   : > { %v625_v14 = vpack.c.bf16 %v616_v10, %v616_v10  ;;  %v697_v15 = vmul.f32 %v687_v12, %v616_v10  ;;  %v720_v16 = vmul.f32 %v616_v10, %v616_v10 }
  0xeb   : > { %v606_v17 = vpop.f32.mrf.mxu3  ;;  %634 = vst [vmem:[%s1324_s23 + $0x20] sm:$0xf] %v625_v14  ;;  %v705_v19 = vadd.f32 %v704_v13, %v697_v15  ;;  %v729_v20 = vmul.f32 %v720_v16, %v687_v12 }
  0xec   : > { %v526_v21 = vpop.f32.mrf.mxu2 }
  0xed   : > { %1084 = shalt.err (!%p1081_p3)
}
  0xee   : > { %s1154_s22 = smov 64   ;;  %s1155_s23 = smov 4   ;;  %v706_v22 = vrot.slane %v705_v19, 4  ;;  %v737_v23 = vadd.f32 %v736_v18, %v729_v20  ;;  %v744_v26 = vlaneseq }
  0xef   : > { %1004 = dma.vmem_to_hbm [thread:$0]  (%p1219_p5), %s1335_s5, 576, %s773_s6, %s753_s7, %s1154_s22, %s1154_s22, %s1155_s23  }
  0xf0   : > { %v707_v24 = vadd.f32 %v706_v22, %v705_v19  ;;  %v738_v25 = vrot.slane %v737_v23, 4  ;;  %s886_s27 = sshll.u32 %s1321_s20, 3  ;;  %s964_s28 = sshll.u32 %s1202_s19, 3  ;;  %v745_v31 = vshrl.u32 %v744_v26, 7 }
  0xf1   : > { %s785_s8 = scalar_lea.hbm %s1387_s4, %s964_s28  ;;  %s202_s5 = scalar_lea.vmem [#allocation4], %s886_s27 }
  0xf2   : > { %v708_v27 = vrot.slane %v707_v24, 2  ;;  %v739_v28 = vadd.f32 %v738_v25, %v737_v23  ;;  %vm746_vm3 = vcmp.eq.s32.totalorder %v745_v31, 0  ;;  %vm748_vm4 = vcmp.eq.s32.totalorder %v745_v31, 1  ;;  %s787_s6 = sshll.u32 %s202_s5, 4  ;;  %s789_s7 = sshll.u32 %s785_s8, 4  ;;  %s788_s6 = int_to_ptr.vmem [resolvable:$true] %s787_s6  ;;  %s790_s7 = int_to_ptr.hbm [resolvable:$true] %s789_s7 }
  0xf3   : > { %s758_s19 = scalar_lea.sflag [#allocation5], %s1321_s20  ;;  %s1099_s9 = sshra.s32 %s790_s7, 4  ;;  %s1100_s9 = int_to_ptr.hbm [resolvable:$true] %s1099_s9 }
  0xf4   : > { %v709_v29 = vadd.f32 %v708_v27, %v707_v24  ;;  %v740_v30 = vrot.slane %v739_v28, 2  ;;  %s1101_s10 = scalar_lea.hbm %s1100_s9, 8  ;;  %s1105_s13 = scalar_lea.hbm %s1387_s4, 16 }
  0xf5   : > { %p1102_p4 = scmp.ne.s32.totalorder %s1100_s9, %s1101_s10  ;;  %p1106_p9 = scmp.lt.s32.totalorder %s1100_s9, %s1387_s4 }
  0xf6   : > { %v710_v32 = vrot.slane %v709_v29, 1  ;;  %v741_v33 = vadd.f32 %v740_v30, %v739_v28  ;;  %p1107_p10 = scmp.lt.s32.totalorder %s1105_s13, %s1101_s10 }
  0xf7   : > { %p1103_p7 = pnand %p1102_p4, %p1219_p5 }
  0xf8   : > { %v711_v34 = vadd.f32 %v710_v32, %v709_v29  ;;  %v742_v35 = vrot.slane %v741_v33, 1  ;;  %p1108_p11 = por %p1107_p10, %p1106_p9 }
  0xf9   : > { %p1104_p8 = pneg %p1103_p7 }
  0xfa   : > { %v743_v36 = vadd.f32 %v742_v35, %v741_v33  ;;  %v747_v37 = vsel %vm746_vm3, %v711_v34, 0.0 }
  0xfb   : > { %p1109_p12 = pnand %p1108_p11, %p1104_p8 }
  0xfc   : > { %v749_v38 = vsel %vm748_vm4, %v743_v36, 0.0 }
  0xfd   : > { %v750_v39 = vadd.f32 %v749_v38, %v747_v37 }
  0xff   : > { %751 = vst [vmem:[%s202_s5] sm:$0xff] %v750_v39 }
 0x100   : > { %1112 = shalt.err (!%p1109_p12)
}
 0x101   : > { %1005 = dma.vmem_to_hbm [thread:$0]  (%p1219_p5), %s788_s6, 128, %s790_s7, %s758_s19  }
 0x102 PF: > { %p1015_p13 = scmp.ge.s32.totalorder %s1151_s18, 2  ;;  %s801_s20 = sand.u32 1, %s1139_s15  }
 0x103   : > { %s802_s23 = scalar_lea.sflag [#allocation3], %s801_s20 }
 0x104   : > { %p1009_p0 = pnand %p1015_p13, %p1223_p6 }
 0x106   : > { %p1010_p1 = pneg %p1009_p0 }
 0x108   : > { %1130 = dma.done.wait (%p1010_p1), %s802_s23, 576  }
 0x109   : > { %1132 = vsyncadd (%p1010_p1), %s802_s23, 4294966720  ;;  %s812_s27 = scalar_lea.sflag [#allocation5], %s801_s20 }
 0x10a   : > { %1134 = dma.done.wait (%p1010_p1), %s812_s27, 128  }
 0x10b   : > { %1136 = vsyncadd (%p1010_p1), %s812_s27, 4294967168  ;;  %p18_p5 = scmp.ge.s32.totalorder %s1206_s21, 4   ;;  %s1390_s15 = smov %s1143_s16 }
 0x10c   : > { %s1391_s16 = smov %s1147_s17  ;;  %s1392_s17 = smov %s1217_s24 }
 0x10d   : > { %s1393_s18 = smov %s1206_s21  ;;  %20 = sbr.rel (!%p18_p5) target bundleno = 5 (0x5), region = 87 }
 0x112   :  { %818 = vsyncpa [#allocation3], 1 }
 0x113   :  { %820 = vsyncpa [#allocation3 + $0x1], 1 }
 0x114   :  { %821 = vsyncpa [#allocation5], 1 }
 0x115   :  { %823 = vsyncpa [#allocation5 + $0x1], 1 }

</bundles_post_ra>
